<compile_context>
chip_gen: v5e
topology: v5e:2x2
jax: 0.10.0
libtpu: 0.0.40
codegen_flags: <defaults>
</compile_context>

<pallas_src>
import jax
import jax.numpy as jnp
import numpy as np
from jax import lax
from jax.experimental import pallas as pl
from jax.experimental.pallas import tpu as pltpu

NBITS = 4            # secret-message bits (0-bit watermarking would use 0)
C_ENC = 32           # encoder.output_dim
K = 7                # encoder stand-in conv kernel size ("keep dimension": same pad)
PAD = K // 2
KP = 8               # K padded up to the sublane tile for the im2col matmul
C_OUT = 2 + NBITS    # last_layer = Conv1d(encoder.output_dim, 2 + nbits, 1)
TT_MAX = 16384       # time-tile width (lanes); safe for v5e 16 MiB scoped VMEM,
                     # re-sweep per generation (v7x can go larger, bf16 halves it)


def _round_up(v, m):
    return ((v + m - 1) // m) * m


def _detector_kernel(x_ref, halo_ref, w1_ref, b1_ref, wd_ref, bd_ref,
                     out_ref, win_ref, im_ref):
    """One (batch, time-tile) block per grid step.

    x_ref   : (1, 1, TT)        raw audio tile
    halo_ref: (1, 1, 128)       [left halo (PAD) | right halo (PAD) | zeros]
    w1_ref  : (C_ENC, KP)       encoder conv weight, zero-padded K -> KP columns
    b1_ref  : (C_ENC, 1)
    wd_ref  : (1, C_ENC)        w2[0] - w2[1]   (only channels the forward returns)
    bd_ref  : (1,)  [SMEM]      b2[0] - b2[1]
    out_ref : (1, 2, TT)        softmax-ed detection scores
    win_ref : (1, TT + 2*PAD)   VMEM scratch: padded window
    im_ref  : (KP, TT)          VMEM scratch: im2col stack of shifted windows
    """
    TT = im_ref.shape[-1]

    # Stitch the 'same'-padding window: [left halo | tile | right halo].
    win_ref[:, PAD:PAD + TT] = x_ref[0, :, :]
    win_ref[:, 0:PAD] = halo_ref[0, :, 0:PAD]
    win_ref[:, PAD + TT:PAD + TT + PAD] = halo_ref[0, :, PAD:2 * PAD]

    # im2col: K shifted copies of the window -> (KP, TT).  Row K..KP-1 carries zero
    # weight but is zeroed anyway so stale VMEM (possibly NaN) can never leak in.
    for k in range(K):                       # static unroll, K is tiny
        im_ref[k:k + 1, :] = win_ref[:, k:k + TT]
    im_ref[K:KP, :] = jnp.zeros((KP - K, TT), jnp.float32)

    # Encoder stand-in: Conv1d(1 -> C_ENC, K, 'same') as one MXU matmul, then ELU.
    h = jnp.dot(w1_ref[...], im_ref[...], preferred_element_type=jnp.float32)
    h = h + b1_ref[...]
    h = jnp.where(h > 0, h, jnp.exp(jnp.minimum(h, 0.0)) - 1.0)   # ELU, inf-safe

    # last_layer restricted to the two returned channels, fused with the 2-way
    # softmax:  softmax([z0, z1])[0] == sigmoid(z0 - z1).
    d = jnp.dot(wd_ref[...], h, preferred_element_type=jnp.float32) + bd_ref[0]
    p0 = 1.0 / (1.0 + jnp.exp(-d))
    out_ref[0, 0:1, :] = p0
    out_ref[0, 1:2, :] = 1.0 - p0


def watermark_detector_forward(x, params):
    """x: (B, T) float32 audio. Returns (probs (B, 2, T), message tensor [0.])."""
    w1, b1, w2, b2 = params
    x = x.astype(jnp.float32)
    B, T = x.shape

    TT = min(TT_MAX, _round_up(max(T, 1), 128))
    NT = -(-T // TT)                      # cdiv
    T_p = NT * TT
    if T_p != T:                          # only pads when T is not a tile multiple
        x = jnp.pad(x, ((0, 0), (0, T_p - T)))

    xr = x.reshape(B, NT, TT)
    # Tiny per-tile halo side-array (zeros at the sequence edges == 'same' padding).
    lh = jnp.pad(xr[:, :NT - 1, TT - PAD:], ((0, 0), (1, 0), (0, 0)))   # (B, NT, PAD)
    rh = jnp.pad(xr[:, 1:, :PAD], ((0, 0), (0, 1), (0, 0)))             # (B, NT, PAD)
    halos = jnp.concatenate([lh, rh], axis=-1)                          # (B, NT, 2*PAD)
    halos = jnp.pad(halos, ((0, 0), (0, 0), (0, 128 - 2 * PAD)))        # lane-pad
    halos = halos.reshape(B * NT, 1, 128)

    x_tiles = xr.reshape(B * NT, 1, TT)

    w1p = jnp.pad(w1, ((0, 0), (0, KP - K)))          # (C_ENC, KP), zero column(s)
    b1c = b1.reshape(C_ENC, 1)
    wd = (w2[0] - w2[1]).reshape(1, C_ENC)            # only the 2 returned channels
    bd = (b2[0] - b2[1]).reshape(1)

    out = pl.pallas_call(
        _detector_kernel,
        out_shape=jax.ShapeDtypeStruct((B, 2, T_p), jnp.float32),
        grid_spec=pltpu.PrefetchScalarGridSpec(
            num_scalar_prefetch=0,
            grid=(B, NT),
            in_specs=[
                pl.BlockSpec((1, 1, TT), lambda b, t: (b * NT + t, 0, 0)),
                pl.BlockSpec((1, 1, 128), lambda b, t: (b * NT + t, 0, 0)),
                pl.BlockSpec((C_ENC, KP), lambda b, t: (0, 0)),
                pl.BlockSpec((C_ENC, 1), lambda b, t: (0, 0)),
                pl.BlockSpec((1, C_ENC), lambda b, t: (0, 0)),
                pl.BlockSpec(memory_space=pltpu.MemorySpace.SMEM),
            ],
            out_specs=pl.BlockSpec((1, 2, TT), lambda b, t: (b, 0, t)),
            scratch_shapes=[
                pltpu.VMEM((1, TT + 2 * PAD), jnp.float32),   # padded window
                pltpu.VMEM((KP, TT), jnp.float32),            # im2col stack
            ],
        ),
        compiler_params=pltpu.CompilerParams(
            dimension_semantics=("parallel", "parallel"),     # megacore over B x tiles
            vmem_limit_bytes=32 * 1024 * 1024,
        ),
    )(x_tiles, halos, w1p, b1c, wd, bd)

    probs = out[:, :, :T] if T_p != T else out
    # PyTorch forward returns (result[:, :2, :], torch.Tensor([0]))
    return probs, jnp.array([0.0], jnp.float32)


def init_params(key):
    k1, k2, k3, k4 = jax.random.split(key, 4)
    w1 = 0.3 * jax.random.normal(k1, (C_ENC, K), jnp.float32)
    b1 = 0.1 * jax.random.normal(k2, (C_ENC,), jnp.float32)
    w2 = 0.3 * jax.random.normal(k3, (C_OUT, C_ENC), jnp.float32)
    b2 = 0.1 * jax.random.normal(k4, (C_OUT,), jnp.float32)
    return w1, b1, w2, b2


def ref_forward(x, params):
    """Plain-JAX reference of the ORIGINAL module math (full last layer + softmax)."""
    w1, b1, w2, b2 = params
    xin = x[:, None, :]                                       # (B, 1, T)
    h = lax.conv_general_dilated(
        xin, w1[:, None, :], (1,), [(PAD, PAD)],
        dimension_numbers=("NCH", "OIH", "NCH"))
    h = h + b1[None, :, None]
    h = jnp.where(h > 0, h, jnp.exp(h) - 1.0)
    z = jnp.einsum("oc,bct->bot", w2, h) + b2[None, :, None]
    return jax.nn.softmax(z[:, :2, :], axis=1)


if __name__ == "__main__":
    key = jax.random.PRNGKey(0)
    kx, kp = jax.random.split(key)

    B, T = 2, 256
    x = jax.random.normal(kx, (B, T), jnp.float32)
    params = init_params(kp)

    probs, message = watermark_detector_forward(x, params)
    jax.block_until_ready(probs)

    ref = ref_forward(x, params)
    assert probs.shape == (B, 2, T) and message.shape == (1,)
    np.testing.assert_allclose(np.asarray(probs), np.asarray(ref),
                               rtol=2e-4, atol=2e-5)
    print("KERNEL_OK")
</pallas_src>

<mosaic_0001>
module attributes {stable_mosaic.version = 11 : i64} {
  func.func @_detector_kernel(%arg0: i32, %arg1: i32, %arg2: memref<1x1x256xf32, #tpu.memory_space<vmem>>, %arg3: memref<1x1x128xf32, #tpu.memory_space<vmem>>, %arg4: memref<32x8xf32, #tpu.memory_space<vmem>>, %arg5: memref<32x1xf32, #tpu.memory_space<vmem>>, %arg6: memref<1x32xf32, #tpu.memory_space<vmem>>, %arg7: memref<1xf32, #tpu.memory_space<smem>>, %arg8: memref<1x2x256xf32, #tpu.memory_space<vmem>>, %arg9: memref<1x262xf32, #tpu.memory_space<vmem>>, %arg10: memref<8x256xf32, #tpu.memory_space<vmem>>) attributes {dimension_semantics = [#tpu.dimension_semantics<parallel>, #tpu.dimension_semantics<parallel>], iteration_bounds = array<i64: 2, 1>, scalar_prefetch = 0 : i64, scratch_operands = 2 : i64, tpu.core_type = #tpu.core_type<tc>, window_params = [{transform_indices = @transform_0, window_bounds = array<i64: 1, 1, 256>}, {transform_indices = @transform_1, window_bounds = array<i64: 1, 1, 128>}, {pipeline_mode = #tpu.pipeline_mode<synchronous>, transform_indices = @transform_2, window_bounds = array<i64: 32, 8>}, {pipeline_mode = #tpu.pipeline_mode<synchronous>, transform_indices = @transform_3, window_bounds = array<i64: 32, 1>}, {pipeline_mode = #tpu.pipeline_mode<synchronous>, transform_indices = @transform_4, window_bounds = array<i64: 1, 32>}, {transform_indices = @transform_5, window_bounds = array<i64: 1>}, {transform_indices = @transform_6, window_bounds = array<i64: 1, 2, 256>}]} {
    %c0 = arith.constant 0 : index
    %c0_0 = arith.constant 0 : index
    %c0_1 = arith.constant 0 : index
    %0 = vector.load %arg2[%c0, %c0_0, %c0_1] : memref<1x1x256xf32, #tpu.memory_space<vmem>>, vector<1x1x256xf32>
    %1 = vector.shape_cast %0 : vector<1x1x256xf32> to vector<1x256xf32>
    %c0_2 = arith.constant 0 : index
    %c3 = arith.constant 3 : index
    %2 = vector.load %arg9[%c0_2, %c3] : memref<1x262xf32, #tpu.memory_space<vmem>>, vector<1x256xf32>
    tpu.vector_store %arg9[%c0_2, %c3], %1 {strides = array<i32>} : memref<1x262xf32, #tpu.memory_space<vmem>>, vector<1x256xf32>,
    %c0_3 = arith.constant 0 : index
    %c0_4 = arith.constant 0 : index
    %c0_5 = arith.constant 0 : index
    %3 = vector.load %arg3[%c0_3, %c0_4, %c0_5] : memref<1x1x128xf32, #tpu.memory_space<vmem>>, vector<1x1x3xf32>
    %4 = vector.shape_cast %3 : vector<1x1x3xf32> to vector<1x3xf32>
    %c0_6 = arith.constant 0 : index
    %c0_7 = arith.constant 0 : index
    %5 = vector.load %arg9[%c0_6, %c0_7] : memref<1x262xf32, #tpu.memory_space<vmem>>, vector<1x3xf32>
    tpu.vector_store %arg9[%c0_6, %c0_7], %4 {strides = array<i32>} : memref<1x262xf32, #tpu.memory_space<vmem>>, vector<1x3xf32>,
    %c0_8 = arith.constant 0 : index
    %c0_9 = arith.constant 0 : index
    %c3_10 = arith.constant 3 : index
    %6 = vector.load %arg3[%c0_8, %c0_9, %c3_10] : memref<1x1x128xf32, #tpu.memory_space<vmem>>, vector<1x1x3xf32>
    %7 = vector.shape_cast %6 : vector<1x1x3xf32> to vector<1x3xf32>
    %c0_11 = arith.constant 0 : index
    %c259 = arith.constant 259 : index
    %8 = vector.load %arg9[%c0_11, %c259] : memref<1x262xf32, #tpu.memory_space<vmem>>, vector<1x3xf32>
    tpu.vector_store %arg9[%c0_11, %c259], %7 {strides = array<i32>} : memref<1x262xf32, #tpu.memory_space<vmem>>, vector<1x3xf32>,
    %c0_12 = arith.constant 0 : index
    %c0_13 = arith.constant 0 : index
    %9 = vector.load %arg9[%c0_12, %c0_13] : memref<1x262xf32, #tpu.memory_space<vmem>>, vector<1x256xf32>
    %c0_14 = arith.constant 0 : index
    %c0_15 = arith.constant 0 : index
    %10 = vector.load %arg10[%c0_14, %c0_15] : memref<8x256xf32, #tpu.memory_space<vmem>>, vector<1x256xf32>
    tpu.vector_store %arg10[%c0_14, %c0_15], %9 {strides = array<i32>} : memref<8x256xf32, #tpu.memory_space<vmem>>, vector<1x256xf32>,
    %c0_16 = arith.constant 0 : index
    %c1 = arith.constant 1 : index
    %11 = vector.load %arg9[%c0_16, %c1] : memref<1x262xf32, #tpu.memory_space<vmem>>, vector<1x256xf32>
    %c1_17 = arith.constant 1 : index
    %c0_18 = arith.constant 0 : index
    %12 = vector.load %arg10[%c1_17, %c0_18] : memref<8x256xf32, #tpu.memory_space<vmem>>, vector<1x256xf32>
    tpu.vector_store %arg10[%c1_17, %c0_18], %11 {strides = array<i32>} : memref<8x256xf32, #tpu.memory_space<vmem>>, vector<1x256xf32>,
    %c0_19 = arith.constant 0 : index
    %c2 = arith.constant 2 : index
    %13 = vector.load %arg9[%c0_19, %c2] : memref<1x262xf32, #tpu.memory_space<vmem>>, vector<1x256xf32>
    %c2_20 = arith.constant 2 : index
    %c0_21 = arith.constant 0 : index
    %14 = vector.load %arg10[%c2_20, %c0_21] : memref<8x256xf32, #tpu.memory_space<vmem>>, vector<1x256xf32>
    tpu.vector_store %arg10[%c2_20, %c0_21], %13 {strides = array<i32>} : memref<8x256xf32, #tpu.memory_space<vmem>>, vector<1x256xf32>,
    %c0_22 = arith.constant 0 : index
    %c3_23 = arith.constant 3 : index
    %15 = vector.load %arg9[%c0_22, %c3_23] : memref<1x262xf32, #tpu.memory_space<vmem>>, vector<1x256xf32>
    %c3_24 = arith.constant 3 : index
    %c0_25 = arith.constant 0 : index
    %16 = vector.load %arg10[%c3_24, %c0_25] : memref<8x256xf32, #tpu.memory_space<vmem>>, vector<1x256xf32>
    tpu.vector_store %arg10[%c3_24, %c0_25], %15 {strides = array<i32>} : memref<8x256xf32, #tpu.memory_space<vmem>>, vector<1x256xf32>,
    %c0_26 = arith.constant 0 : index
    %c4 = arith.constant 4 : index
    %17 = vector.load %arg9[%c0_26, %c4] : memref<1x262xf32, #tpu.memory_space<vmem>>, vector<1x256xf32>
    %c4_27 = arith.constant 4 : index
    %c0_28 = arith.constant 0 : index
    %18 = vector.load %arg10[%c4_27, %c0_28] : memref<8x256xf32, #tpu.memory_space<vmem>>, vector<1x256xf32>
    tpu.vector_store %arg10[%c4_27, %c0_28], %17 {strides = array<i32>} : memref<8x256xf32, #tpu.memory_space<vmem>>, vector<1x256xf32>,
    %c0_29 = arith.constant 0 : index
    %c5 = arith.constant 5 : index
    %19 = vector.load %arg9[%c0_29, %c5] : memref<1x262xf32, #tpu.memory_space<vmem>>, vector<1x256xf32>
    %c5_30 = arith.constant 5 : index
    %c0_31 = arith.constant 0 : index
    %20 = vector.load %arg10[%c5_30, %c0_31] : memref<8x256xf32, #tpu.memory_space<vmem>>, vector<1x256xf32>
    tpu.vector_store %arg10[%c5_30, %c0_31], %19 {strides = array<i32>} : memref<8x256xf32, #tpu.memory_space<vmem>>, vector<1x256xf32>,
    %c0_32 = arith.constant 0 : index
    %c6 = arith.constant 6 : index
    %21 = vector.load %arg9[%c0_32, %c6] : memref<1x262xf32, #tpu.memory_space<vmem>>, vector<1x256xf32>
    %c6_33 = arith.constant 6 : index
    %c0_34 = arith.constant 0 : index
    %22 = vector.load %arg10[%c6_33, %c0_34] : memref<8x256xf32, #tpu.memory_space<vmem>>, vector<1x256xf32>
    tpu.vector_store %arg10[%c6_33, %c0_34], %21 {strides = array<i32>} : memref<8x256xf32, #tpu.memory_space<vmem>>, vector<1x256xf32>,
    %cst = arith.constant 0.000000e+00 : f32
    %23 = vector.broadcast %cst : f32 to vector<1x256xf32>
    %c7 = arith.constant 7 : index
    %c0_35 = arith.constant 0 : index
    %24 = vector.load %arg10[%c7, %c0_35] : memref<8x256xf32, #tpu.memory_space<vmem>>, vector<1x256xf32>
    tpu.vector_store %arg10[%c7, %c0_35], %23 {strides = array<i32>} : memref<8x256xf32, #tpu.memory_space<vmem>>, vector<1x256xf32>,
    %c0_36 = arith.constant 0 : index
    %c0_37 = arith.constant 0 : index
    %25 = vector.load %arg4[%c0_36, %c0_37] : memref<32x8xf32, #tpu.memory_space<vmem>>, vector<32x8xf32>
    %c0_38 = arith.constant 0 : index
    %c0_39 = arith.constant 0 : index
    %26 = vector.load %arg10[%c0_38, %c0_39] : memref<8x256xf32, #tpu.memory_space<vmem>>, vector<8x256xf32>
    %cst_40 = arith.constant dense<0.000000e+00> : vector<32x256xf32>
    %27 = tpu.matmul %25, %26, %cst_40 {dimension_numbers = #tpu.dot_dimension_numbers<[1], [0], [0], [1], [0, 0, 1, 1], [], []>} : vector<32x8xf32>, vector<8x256xf32>, vector<32x256xf32> -> vector<32x256xf32>
    %c0_41 = arith.constant 0 : index
    %c0_42 = arith.constant 0 : index
    %28 = vector.load %arg5[%c0_41, %c0_42] : memref<32x1xf32, #tpu.memory_space<vmem>>, vector<32x1xf32>
    %29 = vector.broadcast %28 : vector<32x1xf32> to vector<32x256xf32>
    %30 = arith.addf %27, %29 : vector<32x256xf32>
    %cst_43 = arith.constant 0.000000e+00 : f32
    %31 = vector.broadcast %cst_43 : f32 to vector<32x256xf32>
    %32 = arith.cmpf ogt, %30, %31 : vector<32x256xf32>
    %cst_44 = arith.constant 0.000000e+00 : f32
    %33 = vector.broadcast %cst_44 : f32 to vector<32x256xf32>
    %34 = arith.minimumf %30, %33 : vector<32x256xf32>
    %35 = math.exp %34 : vector<32x256xf32>
    %cst_45 = arith.constant 1.000000e+00 : f32
    %36 = vector.broadcast %cst_45 : f32 to vector<32x256xf32>
    %37 = arith.subf %35, %36 : vector<32x256xf32>
    %38 = arith.select %32, %30, %37 : vector<32x256xi1>, vector<32x256xf32>
    %c0_46 = arith.constant 0 : index
    %c0_47 = arith.constant 0 : index
    %39 = vector.load %arg6[%c0_46, %c0_47] : memref<1x32xf32, #tpu.memory_space<vmem>>, vector<1x32xf32>
    %cst_48 = arith.constant dense<0.000000e+00> : vector<1x256xf32>
    %40 = tpu.matmul %39, %38, %cst_48 {dimension_numbers = #tpu.dot_dimension_numbers<[1], [0], [0], [1], [0, 0, 1, 1], [], []>} : vector<1x32xf32>, vector<32x256xf32>, vector<1x256xf32> -> vector<1x256xf32>
    %c0_49 = arith.constant 0 : index
    %41 = memref.load %arg7[%c0_49] : memref<1xf32, #tpu.memory_space<smem>>
    %42 = vector.broadcast %41 : f32 to vector<1x256xf32>
    %43 = arith.addf %40, %42 : vector<1x256xf32>
    %cst_50 = arith.constant 0.000000e+00 : f32
    %44 = vector.broadcast %cst_50 : f32 to vector<1x256xf32>
    %45 = arith.subf %44, %43 : vector<1x256xf32>
    %46 = math.exp %45 : vector<1x256xf32>
    %cst_51 = arith.constant 1.000000e+00 : f32
    %47 = vector.broadcast %cst_51 : f32 to vector<1x256xf32>
    %48 = arith.addf %47, %46 : vector<1x256xf32>
    %cst_52 = arith.constant 1.000000e+00 : f32
    %49 = vector.broadcast %cst_52 : f32 to vector<1x256xf32>
    %50 = arith.divf %49, %48 : vector<1x256xf32>
    %c0_53 = arith.constant 0 : index
    %c0_54 = arith.constant 0 : index
    %c0_55 = arith.constant 0 : index
    %51 = vector.load %arg8[%c0_53, %c0_54, %c0_55] : memref<1x2x256xf32, #tpu.memory_space<vmem>>, vector<1x1x256xf32>
    %52 = vector.shape_cast %51 : vector<1x1x256xf32> to vector<1x256xf32>
    %53 = vector.shape_cast %50 : vector<1x256xf32> to vector<1x1x256xf32>
    tpu.vector_store %arg8[%c0_53, %c0_54, %c0_55], %53 {strides = array<i32>} : memref<1x2x256xf32, #tpu.memory_space<vmem>>, vector<1x1x256xf32>,
    %cst_56 = arith.constant 1.000000e+00 : f32
    %54 = vector.broadcast %cst_56 : f32 to vector<1x256xf32>
    %55 = arith.subf %54, %50 : vector<1x256xf32>
    %c0_57 = arith.constant 0 : index
    %c1_58 = arith.constant 1 : index
    %c0_59 = arith.constant 0 : index
    %56 = vector.load %arg8[%c0_57, %c1_58, %c0_59] : memref<1x2x256xf32, #tpu.memory_space<vmem>>, vector<1x1x256xf32>
    %57 = vector.shape_cast %56 : vector<1x1x256xf32> to vector<1x256xf32>
    %58 = vector.shape_cast %55 : vector<1x256xf32> to vector<1x1x256xf32>
    tpu.vector_store %arg8[%c0_57, %c1_58, %c0_59], %58 {strides = array<i32>} : memref<1x2x256xf32, #tpu.memory_space<vmem>>, vector<1x1x256xf32>,
    return
  }
  func.func @transform_0(%arg0: i32, %arg1: i32) -> (i32, i32, i32) {
    %c1_i32 = arith.constant 1 : i32
    %0 = arith.muli %arg0, %c1_i32 : i32
    %1 = arith.addi %0, %arg1 : i32
    %c0_i32 = arith.constant 0 : i32
    %c0_i32_0 = arith.constant 0 : i32
    %c0_i32_1 = arith.constant 0 : i32
    return %1, %c0_i32, %c0_i32_0 : i32, i32, i32
  }
  func.func @transform_1(%arg0: i32, %arg1: i32) -> (i32, i32, i32) {
    %c1_i32 = arith.constant 1 : i32
    %0 = arith.muli %arg0, %c1_i32 : i32
    %1 = arith.addi %0, %arg1 : i32
    %c0_i32 = arith.constant 0 : i32
    %c0_i32_0 = arith.constant 0 : i32
    %c0_i32_1 = arith.constant 0 : i32
    return %1, %c0_i32, %c0_i32_0 : i32, i32, i32
  }
  func.func @transform_2(%arg0: i32, %arg1: i32) -> (i32, i32) {
    %c0_i32 = arith.constant 0 : i32
    %c0_i32_0 = arith.constant 0 : i32
    %c0_i32_1 = arith.constant 0 : i32
    return %c0_i32, %c0_i32_0 : i32, i32
  }
  func.func @transform_3(%arg0: i32, %arg1: i32) -> (i32, i32) {
    %c0_i32 = arith.constant 0 : i32
    %c0_i32_0 = arith.constant 0 : i32
    %c0_i32_1 = arith.constant 0 : i32
    return %c0_i32, %c0_i32_0 : i32, i32
  }
  func.func @transform_4(%arg0: i32, %arg1: i32) -> (i32, i32) {
    %c0_i32 = arith.constant 0 : i32
    %c0_i32_0 = arith.constant 0 : i32
    %c0_i32_1 = arith.constant 0 : i32
    return %c0_i32, %c0_i32_0 : i32, i32
  }
  func.func @transform_5(%arg0: i32, %arg1: i32) -> i32 {
    %c0_i32 = arith.constant 0 : i32
    %c0_i32_0 = arith.constant 0 : i32
    return %c0_i32 : i32
  }
  func.func @transform_6(%arg0: i32, %arg1: i32) -> (i32, i32, i32) {
    %c0_i32 = arith.constant 0 : i32
    %c0_i32_0 = arith.constant 0 : i32
    return %arg0, %c0_i32, %arg1 : i32, i32, i32
  }
}

</mosaic_0001>

<bundles_post_ra>
// kernel: tpu_custom_call.1
= control target key start
LH: loop header
LB: loop body
LE: loop exit
PB: predicated region body
PF: predicated region fallthrough
CT: control target
= control target key end

     0   :  { %s1160_s0 = inlined_call_operand.vmem [shape: f32[2,1,256], index: 0, kind: input, shape index: {}]   ;;  %s1161_s1 = inlined_call_operand.vmem [shape: f32[2,1,128], index: 1, kind: input, shape index: {}]   ;;  %s1162_s2 = inlined_call_operand.vmem [shape: f32[32,8], index: 2, kind: input, shape index: {}]   ;;  %s1163_s3 = inlined_call_operand.vmem [shape: f32[32,1], index: 3, kind: input, shape index: {}]   ;;  %s1164_s4 = inlined_call_operand.vmem [shape: f32[1,32], index: 4, kind: input, shape index: {}]   ;;  %s1165_s5 = inlined_call_operand.<no memory space> [shape: f32[1], index: 5, kind: input, shape index: {}]   ;;  %s1166_s6 = inlined_call_operand.hbm [shape: f32[2,2,256], index: 6, kind: output, shape index: {}]  }
   0x1   :  { %11 = sst [smem:[#allocation4]] %s1165_s5 }
   0x2   :  { %12 = vsyncpa [#allocation6], 0 }
   0x3   :  { %14 = vsyncpa [#allocation6 + $0x1], 0  ;;  %s987_s23 = smov 0   ;;  %s989_s24 = smov 0  }
   0x4   :  { %s991_s25 = smov 0   ;;  %s993_s26 = smov 0  }
   0x5   :  { %s995_s27 = smov 0   ;;  %s997_s28 = smov 0  }
   0x6 LB: > { %s735_s5 = sadd.s32 4294967295, %s938_s28   ;;  %s736_s29 = sadd.s32 4294967294, %s938_s28   ;;  %s938_s28 = sphi %s997_s28, %s20_s28   ;;  %s934_s27 = sphi %s995_s27, %s1177_s27   ;;  %s930_s26 = sphi %s993_s26, %s1176_s26   ;;  %s926_s25 = sphi %s991_s25, %s1175_s25   ;;  %s922_s24 = sphi %s989_s24, %s1174_s24   ;;  %s918_s23 = sphi %s987_s23, %s1173_s23  }
   0x7   : > { %s32_s30 = sadd.s32 1, %s934_s27  ;;  %s181_s7 = sadd.s32 1, %s926_s25 }
   0x8   : > { %p34_p0 = scmp.ge.s32.totalorder %s32_s30, 2  ;;  %p191_p1 = scmp.ne.s32.totalorder %s926_s25, %s922_s24 }
   0x9   : > { %p192_p2 = scmp.eq.s32.totalorder %s735_s5, 1  ;;  %p197_p3 = scmp.ne.s32.totalorder %s922_s24, %s918_s23 }
   0xa   : > { %s1179_s30 = smov (%p34_p0, %s32_s30), 0  ;;  %p198_p5 = scmp.eq.s32.totalorder %s736_s29, 1 }
   0xb   : > { %p1027_p4 = por %p192_p2, %p191_p1  ;;  %s176_s9 = ssub.s32 %s934_s27, %s1179_s30 }
   0xc   : > { %p739_p6 = scmp.ge.s32.totalorder %s938_s28, 1  ;;  %p179_p7 = scmp.eq.s32.totalorder %s176_s9, 0 }
   0xd   : > { %p1034_p8 = por %p198_p5, %p197_p3  ;;  %p245_p9 = scmp.lt.s32.totalorder %s938_s28, 3 }
   0xe   : > { %s1040_s11 = scalar_select %p179_p7, %s926_s25, %s181_s7  }
   0xf   : > { %p246_p10 = pnand %p739_p6, %p245_p9 }
  0x10   : > { %p280_p11 = scmp.lt.s32.totalorder (!%p246_p10), %s930_s26, 1  ;;  %s940_s17 = smov (!%p246_p10), 3  }
  0x11   : > { %249 = sbr.rel (%p246_p10) target bundleno = 629 (0x275), region = 44  ;;  %s941_s21 = smov (!%p246_p10), 124  }
  0x12   : > { %s942_s22 = smov (!%p246_p10), 126   ;;  %s943_s5 = smov (!%p246_p10), 127  }
  0x13   : > { %s944_s29 = smov (!%p246_p10), 123   ;;  %s945_s7 = smov (!%p246_p10), 125  }
  0x14   : > { %s946_s9 = smov (!%p246_p10), 122   ;;  %s537_s15 = sld [smem:[#allocation4]] (!%p246_p10) }
  0x15   : > { %s766_s18 = sshll.u32 (!%p246_p10), %s930_s26, 2  ;;  %s880_s14 = scalar_lea.hbm (!%p246_p10), %s1166_s6, 8 }
  0x16   : > { %s281_s12 = scalar_select %p280_p11, %s930_s26, 1  ;;  %v299_v1 = vlaneseq  ;;  %vm296_vm2 = vcmask 23552   ;;  %vm356_vm8 = vcmask 1014784   ;;  %v947_v19 = vmov 0.0   ;;  %v396_v23 = vld [vmem:[%s1163_s3 + $0x18] sm:$0xff]  ;;  %v393_v26 = vld [vmem:[%s1163_s3] sm:$0xff] }
  0x17   : > { %vm367_vm9 = vcmask 1006592   ;;  %v948_v24 = vmov 0   ;;  %vm334_vm10 = vcmask 1031168   ;;  %vm323_vm11 = vcmask 1039360   ;;  %v394_v33 = vld [vmem:[%s1163_s3 + $0x8] sm:$0xff]  ;;  %v395_v34 = vld [vmem:[%s1163_s3 + $0x10] sm:$0xff] }
  0x18   : > { %s741_s13 = sshll.u32 %s281_s12, 1  ;;  %vm1047_vm0 = vcmp.ge.s32.totalorder %v299_v1, 3  ;;  %vm301_vm1 = vcmp.lt.s32.totalorder %v299_v1, 259  ;;  %s288_s20 = scalar_lea.vmem %s1161_s1, %s281_s12  ;;  %vm310_vm3 = vcmp.lt.s32.totalorder %v299_v1, 6  ;;  %vm306_vm5 = vcmp.lt.s32.totalorder %v299_v1, 3  ;;  %833 = vset.pattern.permute.xlu1 %v948_v24  ;;  %835 = vset.pattern.permute.xlu0 %v948_v24  ;;  %v387_v40 = vld [vmem:[%s1162_s2] sm:$0xff] }
  0x19   : > { %s283_s16 = scalar_lea.vmem %s1160_s0, %s741_s13  ;;  %vm302_vm4 = vmand %vm1047_vm0, %vm301_vm1  ;;  %v304_v5 = vld [vmem:[%s288_s20] sm:$0x1]  ;;  %vm1058_vm7 = vcmp.lt.s32.totalorder %v299_v1, 256  ;;  %834 = vset.pattern.permute.xlu2 %v948_v24  ;;  %vm345_vm12 = vcmask 1022976   ;;  %vm378_vm13 = vcmask 998400   ;;  %vm417_vm14 = vcmask 64512  }
  0x1a   : > { %v291_v0 = vld [vmem:[%s283_s16] sm:$0x3]  ;;  %vm311_vm6 = vmand %vm1047_vm0, %vm310_vm3  ;;  %385 = vst.msk [vmem:[#allocation3 + $0x7] ss:$8 sm:$0x3] %vm1058_vm7, %v947_v19  ;;  %v390_v43 = vld [vmem:[%s1162_s2 + $0x18] sm:$0xff] }
  0x1b   : > { %293 = vrot.lane.b32.xlu0 %v291_v0, %s940_s17  ;;  %v309_v6 = vld [vmem:[%s288_s20] sm:$0x1]  ;;  %v388_v44 = vld [vmem:[%s1162_s2 + $0x8] sm:$0xff]  ;;  %v389_v45 = vld [vmem:[%s1162_s2 + $0x10] sm:$0xff]  ;;  %s276_s16 = sand.u32 1, %s922_s24  }
  0x1c   : > { %s740_s17 = sshll.u32 %s276_s16, 2 }
  0x1d   : > { %s278_s26 = scalar_lea.vmem [#allocation5], %s740_s17 }
  0x8d   : > { %v294_v3 = vpop.permute.xlu0 %293 }
  0x8e   : > { %v295_v4 = vrot.slane %v294_v3, 7 }
  0x90   : > { %v297_v7 = vsel %vm296_vm2, %v295_v4, %v294_v3 }
  0x91   : > { %303 = vst.msk [vmem:[#allocation2] sm:$0x7] %vm302_vm4, %v297_v7 }
  0x92   : > { %308 = vst.msk [vmem:[#allocation2] sm:$0x1] %vm306_vm5, %v304_v5 }
  0x93   : > { %312 = vst.msk [vmem:[#allocation2 + $0x2] sm:$0x1] %vm311_vm6, %v309_v6  ;;  %vm539_vm6 = vcmask 261120  }
  0x99   : > { %v313_v9 = vld [vmem:[#allocation2] sm:$0x3] }
  0x9a   : > { %v351_v10 = vld [vmem:[#allocation2] sm:$0x7]  ;;  %316 = vst.msk [vmem:[#allocation3] ss:$8 sm:$0x3] %vm1058_vm7, %v313_v9 }
  0x9b   : > { %v329_v11 = vld [vmem:[#allocation2] sm:$0x7]  ;;  %353 = vrot.lane.b32.xlu2 %v351_v10, %s941_s21  ;;  %s651_s21 = scalar_lea.hbm %s1166_s6, %s766_s18 }
  0x9c   : > { %v318_v12 = vld [vmem:[#allocation2] sm:$0x7]  ;;  %331 = vrot.lane.b32.xlu1 %v329_v11, %s942_s22  ;;  %s653_s22 = sshll.u32 %s278_s26, 4  ;;  %s654_s22 = int_to_ptr.vmem [resolvable:$true] %s653_s22 }
  0x9d   : > { %320 = vrot.lane.b32.xlu0 %v318_v12, %s943_s5  ;;  %v362_v13 = vld [vmem:[#allocation2] sm:$0x7]  ;;  %s655_s5 = sshll.u32 %s651_s21, 4  ;;  %s656_s5 = int_to_ptr.hbm [resolvable:$true] %s655_s5 }
  0x9e   : > { %v340_v14 = vld [vmem:[#allocation2] sm:$0x7] }
  0x9f   : > { %v373_v15 = vld [vmem:[#allocation2] sm:$0x7] }
  0xa3   : > { %364 = vrot.lane.b32.xlu2 %v362_v13, %s944_s29  ;;  %s638_s29 = scalar_lea.sflag [#allocation6], %s276_s16 }
  0xa4   : > { %342 = vrot.lane.b32.xlu1 %v340_v14, %s945_s7  ;;  %s874_s7 = sshra.s32 %s656_s5, 4  ;;  %s875_s7 = int_to_ptr.hbm [resolvable:$true] %s874_s7 }
  0xa5   : > { %375 = vrot.lane.b32.xlu0 %v373_v15, %s946_s9  ;;  %s876_s9 = scalar_lea.hbm %s875_s7, 4  ;;  %p881_p1 = scmp.lt.s32.totalorder %s875_s7, %s1166_s6 }
  0xa6   : > { %p877_p12 = scmp.ne.s32.totalorder %s875_s7, %s876_s9  ;;  %p882_p2 = scmp.lt.s32.totalorder %s880_s14, %s876_s9 }
  0xa8   : > { %p878_p13 = pnand %p877_p12, %p1027_p4  ;;  %p883_p3 = por %p882_p2, %p881_p1 }
  0xaa   : > { %p879_p0 = pneg %p878_p13 }
  0xab   : > { %409 = vperm.xlu2 %834, %v395_v34  }
  0xac   : > { %414 = vperm.xlu1 %833, %v396_v23   ;;  %p884_p5 = pnand %p883_p3, %p879_p0 }
  0xad   : > { %404 = vperm.xlu0 %835, %v394_v33  }
  0xb4   : > { %399 = vperm.xlu1 %833, %v393_v26  }
  0xf5   : > { %v354_v16 = vpop.permute.xlu2 %353 }
  0xf6   : > { %v355_v17 = vrot.slane %v354_v16, 1 }
  0xf8   : > { %v357_v18 = vsel %vm356_vm8, %v354_v16, %v355_v17 }
  0xf9   : > { %360 = vst.msk [vmem:[#allocation3 + $0x4] ss:$8 sm:$0x3] %vm1058_vm7, %v357_v18 }
  0xfd   : > { %v365_v20 = vpop.permute.xlu2 %364 }
  0xfe   : > { %v366_v21 = vrot.slane %v365_v20, 1 }
 0x100   : > { %v368_v22 = vsel %vm367_vm9, %v365_v20, %v366_v21 }
 0x101   : > { %371 = vst.msk [vmem:[#allocation3 + $0x5] ss:$8 sm:$0x3] %vm1058_vm7, %v368_v22 }
 0x105   : > { %v410_v5 = vpop.permute.xlu2 %409 }
 0x10e   : > { %v332_v25 = vpop.permute.xlu1 %331 }
 0x10f   : > { %v333_v27 = vrot.slane %v332_v25, 1  ;;  %v321_v28 = vpop.permute.xlu0 %320 }
 0x110   : > { %v322_v29 = vrot.slane %v321_v28, 1 }
 0x111   : > { %v335_v30 = vsel %vm334_vm10, %v332_v25, %v333_v27 }
 0x112   : > { %338 = vst.msk [vmem:[#allocation3 + $0x2] ss:$8 sm:$0x3] %vm1058_vm7, %v335_v30  ;;  %v324_v31 = vsel %vm323_vm11, %v321_v28, %v322_v29 }
 0x113   : > { %327 = vst.msk [vmem:[#allocation3 + $0x1] ss:$8 sm:$0x3] %vm1058_vm7, %v324_v31 }
 0x116   : > { %v343_v32 = vpop.permute.xlu1 %342 }
 0x117   : > { %v344_v35 = vrot.slane %v343_v32, 1  ;;  %v376_v36 = vpop.permute.xlu0 %375 }
 0x118   : > { %v377_v37 = vrot.slane %v376_v36, 1 }
 0x119   : > { %v346_v38 = vsel %vm345_vm12, %v343_v32, %v344_v35 }
 0x11a   : > { %349 = vst.msk [vmem:[#allocation3 + $0x3] ss:$8 sm:$0x3] %vm1058_vm7, %v346_v38  ;;  %v379_v39 = vsel %vm378_vm13, %v376_v36, %v377_v37 }
 0x11b   : > { %382 = vst.msk [vmem:[#allocation3 + $0x6] ss:$8 sm:$0x3] %vm1058_vm7, %v379_v39 }
 0x11e   : > { %v415_v46 = vpop.permute.xlu1 %414 }
 0x11f   : > { %v405_v51 = vpop.permute.xlu0 %404 }
 0x122   : > { %v391_v41 = vld [vmem:[#allocation3] sm:$0xff]  ;;  %v392_v42 = vld [vmem:[#allocation3 + $0x8] sm:$0xff] }
 0x123   : > { %445 = vmatpush.msra.mxu0 %v391_v41  ;;  %767 = vmatpush.msra.mxu2 %v391_v41  ;;  %v536_v41 = vld [vmem:[%s1164_s4] sm:$0x1] }
 0x124   : > { %474 = vmatpush.msra.mxu1 %v392_v42  ;;  %768 = vmatpush.msra.mxu3 %v392_v42 }
 0x125   : > { %742 = vmatmul.msk.f32.vlgmr.msra.gmra.mxu0 %vm417_vm14, %v387_v40  ;;  %745 = vmatmul.msk.f32.vlgmr.msra.gmra.mxu2 %vm417_vm14, %v390_v43 }
 0x126   : > { %746 = vmatmul.msk.f32.vlgmr.msra.gmra.mxu1 %vm417_vm14, %v387_v40  ;;  %749 = vmatmul.msk.f32.vlgmr.msra.gmra.mxu3 %vm417_vm14, %v390_v43  ;;  %v400_v49 = vpop.permute.xlu1 %399 }
 0x12d   : > { %743 = vmatmul.msk.f32.gmra.mxu0 %vm417_vm14, %v388_v44 }
 0x12e   : > { %747 = vmatmul.msk.f32.gmra.mxu1 %vm417_vm14, %v388_v44  ;;  %v538_v44 = vstv %s537_s15 }
 0x135   : > { %744 = vmatmul.msk.f32.gmra.mxu0 %vm417_vm14, %v389_v45 }
 0x136   : > { %748 = vmatmul.msk.f32.gmra.mxu1 %vm417_vm14, %v389_v45 }
 0x1a2   : > { %v447_v47 = vpop.f32.mrf.mxu0 }
 0x1a3   : > { %v476_v48 = vpop.f32.mrf.mxu1  ;;  %v1102_v52 = vadd.f32 %v447_v47, %v400_v49 }
 0x1a4   : > { %v1104_v55 = vadd.f32 %v476_v48, %v400_v49 }
 0x1a5   : > { %v496_v63 = vmin.f32 %v1102_v52, 0.0  ;;  %vm488_vm5 = vcmp.gt.f32.partialorder %v1102_v52, 0.0 }
 0x1a6   : > { %v497_v1 = vmin.f32 %v1104_v55, 0.0  ;;  %vm489_vm8 = vcmp.gt.f32.partialorder %v1104_v55, 0.0 }
 0x1a7   : > { %v504_v6 = vmul.f32 1.442695, %v496_v63 }
 0x1a8   : > { %v456_v50 = vpop.f32.mrf.mxu2  ;;  %v506_v7 = vmul.f32 1.442695, %v497_v1 }
 0x1a9   : > { %v457_v53 = vadd.f32 %v456_v50, %v415_v46  ;;  %v485_v54 = vpop.f32.mrf.mxu3 }
 0x1aa   : > { %v486_v56 = vadd.f32 %v485_v54, %v415_v46  ;;  %v450_v57 = vpop.f32.mrf.mxu0 }
 0x1ab   : > { %v502_v58 = vmin.f32 %v457_v53, 0.0  ;;  %v451_v59 = vadd.f32 %v450_v57, %v405_v51  ;;  %v479_v60 = vpop.f32.mrf.mxu1  ;;  %vm494_vm15 = vcmp.gt.f32.partialorder %v457_v53, 0.0 }
 0x1ac   : > { %v503_v61 = vmin.f32 %v486_v56, 0.0  ;;  %v480_v62 = vadd.f32 %v479_v60, %v405_v51  ;;  %vm495_vm0 = vcmp.gt.f32.partialorder %v486_v56, 0.0 }
 0x1ad   : > { %v516_v0 = vmul.f32 1.442695, %v502_v58  ;;  %v498_v3 = vmin.f32 %v451_v59, 0.0  ;;  %vm490_vm3 = vcmp.gt.f32.partialorder %v451_v59, 0.0 }
 0x1ae   : > { %v518_v2 = vmul.f32 1.442695, %v503_v61  ;;  %v499_v4 = vmin.f32 %v480_v62, 0.0  ;;  %vm491_vm4 = vcmp.gt.f32.partialorder %v480_v62, 0.0 }
 0x1af   : > { %836 = vpow2.f32 %v516_v0  ;;  %v508_v10 = vmul.f32 1.442695, %v498_v3 }
 0x1b0   : > { %838 = vpow2.f32 %v518_v2  ;;  %v510_v13 = vmul.f32 1.442695, %v499_v4 }
 0x1b1   : > { %840 = vpow2.f32 %v504_v6 }
 0x1b2   : > { %v453_v9 = vpop.f32.mrf.mxu0  ;;  %842 = vpow2.f32 %v506_v7 }
 0x1b3   : > { %v454_v11 = vadd.f32 %v453_v9, %v410_v5  ;;  %v482_v12 = vpop.f32.mrf.mxu1  ;;  %844 = vpow2.f32 %v508_v10 }
 0x1b4   : > { %v483_v14 = vadd.f32 %v482_v12, %v410_v5  ;;  %846 = vpow2.f32 %v510_v13 }
 0x1b5   : > { %v837_v15 = vpop.eup %836  ;;  %v500_v16 = vmin.f32 %v454_v11, 0.0  ;;  %vm492_vm1 = vcmp.gt.f32.partialorder %v454_v11, 0.0 }
 0x1b6   : > { %v839_v17 = vpop.eup %838  ;;  %v501_v18 = vmin.f32 %v483_v14, 0.0  ;;  %v756_v19 = vadd.f32 -1.0, %v837_v15  ;;  %vm493_vm2 = vcmp.gt.f32.partialorder %v483_v14, 0.0 }
 0x1b7   : > { %v512_v20 = vmul.f32 1.442695, %v500_v16  ;;  %v757_v21 = vadd.f32 -1.0, %v839_v17  ;;  %v841_v25 = vpop.eup %840 }
 0x1b8   : > { %v514_v22 = vmul.f32 1.442695, %v501_v18  ;;  %v534_v23 = vsel %vm494_vm15, %v457_v53, %v756_v19  ;;  %v843_v26 = vpop.eup %842  ;;  %v750_v36 = vadd.f32 -1.0, %v841_v25 }
 0x1b9   : > { %848 = vpow2.f32 %v512_v20  ;;  %555 = vmatpush.msrb.mxu2 %v534_v23  ;;  %v535_v24 = vsel %vm495_vm0, %v486_v56, %v757_v21  ;;  %v845_v27 = vpop.eup %844  ;;  %v751_v38 = vadd.f32 -1.0, %v843_v26 }
 0x1ba   : > { %850 = vpow2.f32 %v514_v22  ;;  %575 = vmatpush.msrb.mxu3 %v535_v24  ;;  %v847_v28 = vpop.eup %846  ;;  %v752_v32 = vadd.f32 -1.0, %v845_v27  ;;  %v528_v42 = vsel %vm488_vm5, %v1102_v52, %v750_v36 }
 0x1bb   : > { %v753_v34 = vadd.f32 -1.0, %v847_v28  ;;  %v529_v43 = vsel %vm489_vm8, %v1104_v55, %v751_v38 }
 0x1bc   : > { %v530_v39 = vsel %vm490_vm3, %v451_v59, %v752_v32 }
 0x1bd   : > { %v531_v40 = vsel %vm491_vm4, %v480_v62, %v753_v34 }
 0x1bf   : > { %v849_v29 = vpop.eup %848 }
 0x1c0   : > { %v851_v30 = vpop.eup %850  ;;  %v754_v31 = vadd.f32 -1.0, %v849_v29 }
 0x1c1   : > { %v755_v33 = vadd.f32 -1.0, %v851_v30 }
 0x1c2   : > { %v532_v35 = vsel %vm492_vm1, %v454_v11, %v754_v31  ;;  %vm624_vm1 = vcmask 1040384  }
 0x1c3   : > { %556 = vmatpush.msrb.mxu2 %v532_v35  ;;  %v533_v37 = vsel %vm493_vm2, %v483_v14, %v755_v33 }
 0x1c4   : > { %576 = vmatpush.msrb.mxu3 %v533_v37 }
 0x1c5   : > { %557 = vmatpush.msrb.mxu2 %v530_v39 }
 0x1c6   : > { %577 = vmatpush.msrb.mxu3 %v531_v40 }
 0x1c7   : > { %558 = vmatpush.msrb.mxu2 %v528_v42 }
 0x1c8   : > { %578 = vmatpush.msrb.mxu3 %v529_v43  ;;  %758 = vmatmul.msk.f32.vlgmr.msrb.gmra.mxu2 %vm539_vm6, %v536_v41 }
 0x1c9   : > { %759 = vmatmul.msk.f32.vlgmr.msrb.gmra.mxu3 %vm539_vm6, %v536_v41 }
 0x24b   : > { %v560_v45 = vpop.f32.mrf.mxu2 }
 0x24c   : > { %v561_v46 = vadd.f32 %v560_v45, %v538_v44  ;;  %v580_v47 = vpop.f32.mrf.mxu3 }
 0x24d   : > { %v581_v48 = vadd.f32 %v580_v47, %v538_v44 }
 0x24e   : > { %v583_v49 = vsub.f32 0.0, %v561_v46 }
 0x24f   : > { %v584_v50 = vsub.f32 0.0, %v581_v48 }
 0x250   : > { %v585_v51 = vmul.f32 1.442695, %v583_v49 }
 0x251   : > { %v587_v53 = vmul.f32 1.442695, %v584_v50 }
 0x252   : > { %852 = vpow2.f32 %v585_v51 }
 0x253   : > { %854 = vpow2.f32 %v587_v53 }
 0x258   : > { %v853_v52 = vpop.eup %852 }
 0x259   : > { %v855_v54 = vpop.eup %854  ;;  %v589_v56 = vadd.f32 1.0, %v853_v52 }
 0x25a   : > { %v590_v55 = vadd.f32 1.0, %v855_v54 }
 0x25b   : > { %856 = vrcp.f32 %v589_v56  ;;  %v602_v1 = vand.u32 2147483648, %v589_v56  ;;  %v600_v3 = vand.u32 2147483647, %v589_v56  ;;  %vm596_vm11 = vweird.f32 %v589_v56 }
 0x25c   : > { %858 = vrcp.f32 %v590_v55  ;;  %v617_v0 = vand.u32 2147483648, %v590_v55  ;;  %v615_v4 = vand.u32 2147483647, %v590_v55  ;;  %vm611_vm12 = vweird.f32 %v590_v55 }
 0x25d   : > { %v603_v10 = vor.u32 1.1754944e-38, %v602_v1  ;;  %vm601_vm15 = vcmp.eq.f32.partialorder %v600_v3, 8.507059e+37 }
 0x25e   : > { %v618_v7 = vor.u32 1.1754944e-38, %v617_v0  ;;  %vm616_vm0 = vcmp.eq.f32.partialorder %v615_v4, 8.507059e+37 }
 0x261   : > { %v857_v57 = vpop.eup %856 }
 0x262   : > { %v859_v58 = vpop.eup %858  ;;  %v592_v59 = vmul.f32 %v857_v57, %v589_v56  ;;  %vm597_vm9 = vweird.f32 %v857_v57 }
 0x263   : > { %v607_v60 = vmul.f32 %v859_v58, %v590_v55  ;;  %vm612_vm10 = vweird.f32 %v859_v58  ;;  %vm598_vm13 = vmor %vm596_vm11, %vm597_vm9 }
 0x264   : > { %v593_v61 = vsub.f32 1.0, %v592_v59  ;;  %vm613_vm14 = vmor %vm611_vm12, %vm612_vm10 }
 0x265   : > { %v608_v62 = vsub.f32 1.0, %v607_v60 }
 0x266   : > { %v594_v63 = vmul.f32 %v857_v57, %v593_v61 }
 0x267   : > { %v609_v2 = vmul.f32 %v859_v58, %v608_v62 }
 0x268   : > { %v595_v5 = vadd.f32 %v857_v57, %v594_v63 }
 0x269   : > { %v610_v6 = vadd.f32 %v859_v58, %v609_v2 }
 0x26a   : > { %v599_v9 = vsel %vm598_vm13, %v857_v57, %v595_v5 }
 0x26b   : > { %v614_v11 = vsel %vm613_vm14, %v859_v58, %v610_v6  ;;  %v604_v12 = vsel %vm601_vm15, %v603_v10, %v599_v9 }
 0x26c   : > { %v619_v13 = vsel %vm616_vm0, %v618_v7, %v614_v11  ;;  %v628_v17 = vsub.f32 1.0, %v604_v12 }
 0x26d   : > { %v623_v14 = vrot.slane %v619_v13, 7  ;;  %v629_v15 = vsub.f32 1.0, %v619_v13 }
 0x26f   : > { %v625_v16 = vsel %vm624_vm1, %v604_v12, %v623_v14  ;;  %v632_v18 = vrot.slane %v629_v15, 7 }
 0x270   : > { %627 = vst.msk [vmem:[%s278_s26] ss:$2 sm:$0x3] %vm1058_vm7, %v625_v16 }
 0x271   : > { %v633_v19 = vsel %vm624_vm1, %v628_v17, %v632_v18 }
 0x272   : > { %760 = vst.msk [vmem:[%s278_s26 + $0x1] ss:$2 sm:$0x3] %vm1058_vm7, %v633_v19 }
 0x273   : > { %887 = shalt.err (!%p884_p5)
}
 0x274   : > { %769 = dma.vmem_to_hbm [thread:$0]  (%p1027_p4), %s654_s22, 64, %s656_s5, %s638_s29  }
 0x275 PF: > { %p775_p6 = scmp.ge.s32.totalorder %s938_s28, 2  ;;  %s667_s16 = sand.u32 1, %s918_s23  }
 0x276   : > { %s668_s18 = scalar_lea.sflag [#allocation6], %s667_s16 }
 0x277   : > { %p772_p7 = pnand %p775_p6, %p1034_p8 }
 0x279   : > { %p773_p9 = pneg %p772_p7 }
 0x27b   : > { %913 = dma.done.wait (%p773_p9), %s668_s18, 64  }
 0x27c   : > { %915 = vsyncadd (%p773_p9), %s668_s18, 4294967232  ;;  %s20_s28 = sadd.s32 1, %s938_s28   ;;  %s1173_s23 = smov %s922_s24 }
 0x27d   : > { %p17_p10 = scmp.ge.s32.totalorder %s20_s28, 4   ;;  %s1174_s24 = smov %s926_s25 }
 0x27e   : > { %s1175_s25 = smov %s1040_s11  ;;  %s1176_s26 = smov %s934_s27 }
 0x27f   : > { %s1177_s27 = smov %s1179_s30  ;;  %19 = sbr.rel (!%p17_p10) target bundleno = 6 (0x6), region = 90 }
 0x284   :  { %674 = vsyncpa [#allocation6], 1 }
 0x285   :  { %676 = vsyncpa [#allocation6 + $0x1], 1 }

</bundles_post_ra>
